<compile_context>
chip_gen: v7x
topology: tpu7x:2x2x1
jax: 0.10.0
libtpu: 0.0.40
codegen_flags: <defaults>
</compile_context>

<pallas_src>
import jax
import jax.numpy as jnp
from jax.experimental import pallas as pl
from jax.experimental.pallas import tpu as pltpu

LANE = 128
SUBLANE = 8


def _round_up(n, m):
    return ((n + m - 1) // m) * m


def _shallow_mlp_kernel(x_ref, w1_ref, b1_ref, w2_ref, b2_ref, o_ref):
    """One batch tile: sigmoid(relu(x @ W1 + b1) @ W2 + b2)."""
    x = x_ref[...]                                                  # bf16 [TB, Kp]
    h = jnp.dot(x, w1_ref[...], preferred_element_type=jnp.float32) + b1_ref[...]
    h = jnp.maximum(h, 0.0)                                         # ReLU on VPU
    z = jnp.dot(h.astype(jnp.bfloat16), w2_ref[...],
                preferred_element_type=jnp.float32) + b2_ref[...]
    # sigmoid(z) = 1 / (1 + exp(-z)); exp and approx reciprocal both run on the EUP.
    o_ref[...] = pl.reciprocal(1.0 + jnp.exp(-z), approx=True)


def shallow_feedforward_pallas(x, w1, b1, w2, b2, *, tile_b=512):
    """x: [batch, in] f32. w1: [in, hid], b1: [hid], w2: [hid, out], b2: [out]."""
    batch, in_size = x.shape
    hid_size = w1.shape[1]
    out_size = w2.shape[1]

    kp = _round_up(in_size, LANE)      # contraction dim of layer 1
    hp = _round_up(hid_size, LANE)     # hidden dim (lane-dense)
    op = _round_up(out_size, LANE)     # output dim (lane-dense stores)

    tb = min(tile_b, _round_up(batch, SUBLANE))   # batch tile, multiple of 8
    bp = _round_up(batch, tb)                     # padded batch

    # Zero-pad everything (zeros are exactly preserved through matmul/ReLU, and the
    # padded output columns/rows are sliced off below).
    x_p = jnp.zeros((bp, kp), jnp.bfloat16).at[:batch, :in_size].set(
        x.astype(jnp.bfloat16))
    w1_p = jnp.zeros((kp, hp), jnp.bfloat16).at[:in_size, :hid_size].set(
        w1.astype(jnp.bfloat16))
    b1_p = jnp.zeros((1, hp), jnp.float32).at[0, :hid_size].set(b1.astype(jnp.float32))
    w2_p = jnp.zeros((hp, op), jnp.bfloat16).at[:hid_size, :out_size].set(
        w2.astype(jnp.bfloat16))
    b2_p = jnp.zeros((1, op), jnp.float32).at[0, :out_size].set(b2.astype(jnp.float32))

    grid = (bp // tb,)

    cost = pl.CostEstimate(
        flops=2 * bp * (kp * hp + hp * op),
        transcendentals=bp * op,
        bytes_accessed=(x_p.size * 2            # bf16 x
                        + w1_p.size * 2 + w2_p.size * 2
                        + b1_p.size * 4 + b2_p.size * 4
                        + bp * op * 4),         # f32 output
    )

    out_padded = pl.pallas_call(
        _shallow_mlp_kernel,
        out_shape=jax.ShapeDtypeStruct((bp, op), jnp.float32),
        grid=grid,
        in_specs=[
            pl.BlockSpec((tb, kp), lambda i: (i, 0)),   # x: streamed per batch tile
            pl.BlockSpec((kp, hp), lambda i: (0, 0)),   # W1: VMEM-resident
            pl.BlockSpec((1, hp), lambda i: (0, 0)),    # b1: VMEM-resident
            pl.BlockSpec((hp, op), lambda i: (0, 0)),   # W2: VMEM-resident
            pl.BlockSpec((1, op), lambda i: (0, 0)),    # b2: VMEM-resident
        ],
        out_specs=pl.BlockSpec((tb, op), lambda i: (i, 0)),
        compiler_params=pltpu.CompilerParams(
            dimension_semantics=("parallel",)),
        cost_estimate=cost,
    )(x_p, w1_p, b1_p, w2_p, b2_p)

    return out_padded[:batch, :out_size]


def reference_forward(x, w1, b1, w2, b2, *, bf16_matmul=False):
    """Pure-JAX reference matching the PyTorch module's forward."""
    if bf16_matmul:
        h = jnp.dot(x.astype(jnp.bfloat16), w1.astype(jnp.bfloat16),
                    preferred_element_type=jnp.float32) + b1
        h = jnp.maximum(h, 0.0)
        z = jnp.dot(h.astype(jnp.bfloat16), w2.astype(jnp.bfloat16),
                    preferred_element_type=jnp.float32) + b2
    else:
        h = jnp.maximum(x @ w1 + b1, 0.0)
        z = h @ w2 + b2
    return jax.nn.sigmoid(z)


if __name__ == "__main__":
    # Small shapes consistent with Shallow_Feedforward(in_size, hid_size, out_size).
    batch, in_size, hid_size, out_size = 16, 32, 64, 4

    key = jax.random.PRNGKey(0)
    kx, kw1, kb1, kw2, kb2 = jax.random.split(key, 5)

    x = jax.random.normal(kx, (batch, in_size), jnp.float32)

    # PyTorch nn.Linear-style init: U(-1/sqrt(fan_in), 1/sqrt(fan_in)).
    bound1 = 1.0 / jnp.sqrt(jnp.float32(in_size))
    w1 = jax.random.uniform(kw1, (in_size, hid_size), jnp.float32, -bound1, bound1)
    b1 = jax.random.uniform(kb1, (hid_size,), jnp.float32, -bound1, bound1)
    bound2 = 1.0 / jnp.sqrt(jnp.float32(hid_size))
    w2 = jax.random.uniform(kw2, (hid_size, out_size), jnp.float32, -bound2, bound2)
    b2 = jax.random.uniform(kb2, (out_size,), jnp.float32, -bound2, bound2)

    out = shallow_feedforward_pallas(x, w1, b1, w2, b2)
    out = jax.block_until_ready(out)
    assert out.shape == (batch, out_size)

    # Tight check vs a reference using the same bf16 matmul inputs (only the
    # approx-reciprocal differs), plus a looser check vs pure-f32 semantics.
    ref_bf16 = reference_forward(x, w1, b1, w2, b2, bf16_matmul=True)
    ref_f32 = reference_forward(x, w1, b1, w2, b2, bf16_matmul=False)
    assert jnp.allclose(out, ref_bf16, atol=5e-3, rtol=0), "mismatch vs bf16 reference"
    assert jnp.allclose(out, ref_f32, atol=3e-2, rtol=0), "mismatch vs f32 reference"

    print("KERNEL_OK")
</pallas_src>

<mosaic_0001>
module attributes {stable_mosaic.version = 11 : i64} {
  func.func @_shallow_mlp_kernel(%arg0: i32, %arg1: memref<16x128xbf16, #tpu.memory_space<vmem>>, %arg2: memref<128x128xbf16, #tpu.memory_space<vmem>>, %arg3: memref<1x128xf32, #tpu.memory_space<vmem>>, %arg4: memref<128x128xbf16, #tpu.memory_space<vmem>>, %arg5: memref<1x128xf32, #tpu.memory_space<vmem>>, %arg6: memref<16x128xf32, #tpu.memory_space<vmem>>) attributes {dimension_semantics = [#tpu.dimension_semantics<parallel>], iteration_bounds = array<i64: 1>, scalar_prefetch = 0 : i64, scratch_operands = 0 : i64, tpu.core_type = #tpu.core_type<tc>, window_params = [{transform_indices = @transform_0, window_bounds = array<i64: 16, 128>}, {pipeline_mode = #tpu.pipeline_mode<synchronous>, transform_indices = @transform_1, window_bounds = array<i64: 128, 128>}, {pipeline_mode = #tpu.pipeline_mode<synchronous>, transform_indices = @transform_2, window_bounds = array<i64: 1, 128>}, {pipeline_mode = #tpu.pipeline_mode<synchronous>, transform_indices = @transform_3, window_bounds = array<i64: 128, 128>}, {pipeline_mode = #tpu.pipeline_mode<synchronous>, transform_indices = @transform_4, window_bounds = array<i64: 1, 128>}, {transform_indices = @transform_5, window_bounds = array<i64: 16, 128>}]} {
    %c0 = arith.constant 0 : index
    %c0_0 = arith.constant 0 : index
    %0 = vector.load %arg1[%c0, %c0_0] : memref<16x128xbf16, #tpu.memory_space<vmem>>, vector<16x128xbf16>
    %c0_1 = arith.constant 0 : index
    %c0_2 = arith.constant 0 : index
    %1 = vector.load %arg2[%c0_1, %c0_2] : memref<128x128xbf16, #tpu.memory_space<vmem>>, vector<128x128xbf16>
    %cst = arith.constant dense<0.000000e+00> : vector<16x128xf32>
    %2 = tpu.matmul %0, %1, %cst {dimension_numbers = #tpu.dot_dimension_numbers<[1], [0], [0], [1], [0, 0, 1, 1], [], []>} : vector<16x128xbf16>, vector<128x128xbf16>, vector<16x128xf32> -> vector<16x128xf32>
    %c0_3 = arith.constant 0 : index
    %c0_4 = arith.constant 0 : index
    %3 = vector.load %arg3[%c0_3, %c0_4] : memref<1x128xf32, #tpu.memory_space<vmem>>, vector<1x128xf32>
    %4 = vector.broadcast %3 : vector<1x128xf32> to vector<16x128xf32>
    %5 = arith.addf %2, %4 : vector<16x128xf32>
    %cst_5 = arith.constant 0.000000e+00 : f32
    %6 = vector.broadcast %cst_5 : f32 to vector<16x128xf32>
    %7 = arith.maximumf %5, %6 : vector<16x128xf32>
    %8 = arith.truncf %7 : vector<16x128xf32> to vector<16x128xbf16>
    %c0_6 = arith.constant 0 : index
    %c0_7 = arith.constant 0 : index
    %9 = vector.load %arg4[%c0_6, %c0_7] : memref<128x128xbf16, #tpu.memory_space<vmem>>, vector<128x128xbf16>
    %cst_8 = arith.constant dense<0.000000e+00> : vector<16x128xf32>
    %10 = tpu.matmul %8, %9, %cst_8 {dimension_numbers = #tpu.dot_dimension_numbers<[1], [0], [0], [1], [0, 0, 1, 1], [], []>} : vector<16x128xbf16>, vector<128x128xbf16>, vector<16x128xf32> -> vector<16x128xf32>
    %c0_9 = arith.constant 0 : index
    %c0_10 = arith.constant 0 : index
    %11 = vector.load %arg5[%c0_9, %c0_10] : memref<1x128xf32, #tpu.memory_space<vmem>>, vector<1x128xf32>
    %12 = vector.broadcast %11 : vector<1x128xf32> to vector<16x128xf32>
    %13 = arith.addf %10, %12 : vector<16x128xf32>
    %cst_11 = arith.constant 0.000000e+00 : f32
    %14 = vector.broadcast %cst_11 : f32 to vector<16x128xf32>
    %15 = arith.subf %14, %13 : vector<16x128xf32>
    %16 = math.exp %15 : vector<16x128xf32>
    %cst_12 = arith.constant 1.000000e+00 : f32
    %17 = vector.broadcast %cst_12 : f32 to vector<16x128xf32>
    %18 = arith.addf %17, %16 : vector<16x128xf32>
    %19 = tpu.reciprocal %18 {approx = true} : vector<16x128xf32> -> vector<16x128xf32>
    %c0_13 = arith.constant 0 : index
    %c0_14 = arith.constant 0 : index
    %20 = vector.load %arg6[%c0_13, %c0_14] : memref<16x128xf32, #tpu.memory_space<vmem>>, vector<16x128xf32>
    tpu.vector_store %arg6[%c0_13, %c0_14], %19 {strides = array<i32>} : memref<16x128xf32, #tpu.memory_space<vmem>>, vector<16x128xf32>,
    return
  }
  func.func @transform_0(%arg0: i32) -> (i32, i32) {
    %c0_i32 = arith.constant 0 : i32
    %c0_i32_0 = arith.constant 0 : i32
    return %arg0, %c0_i32 : i32, i32
  }
  func.func @transform_1(%arg0: i32) -> (i32, i32) {
    %c0_i32 = arith.constant 0 : i32
    %c0_i32_0 = arith.constant 0 : i32
    %c0_i32_1 = arith.constant 0 : i32
    return %c0_i32, %c0_i32_0 : i32, i32
  }
  func.func @transform_2(%arg0: i32) -> (i32, i32) {
    %c0_i32 = arith.constant 0 : i32
    %c0_i32_0 = arith.constant 0 : i32
    %c0_i32_1 = arith.constant 0 : i32
    return %c0_i32, %c0_i32_0 : i32, i32
  }
  func.func @transform_3(%arg0: i32) -> (i32, i32) {
    %c0_i32 = arith.constant 0 : i32
    %c0_i32_0 = arith.constant 0 : i32
    %c0_i32_1 = arith.constant 0 : i32
    return %c0_i32, %c0_i32_0 : i32, i32
  }
  func.func @transform_4(%arg0: i32) -> (i32, i32) {
    %c0_i32 = arith.constant 0 : i32
    %c0_i32_0 = arith.constant 0 : i32
    %c0_i32_1 = arith.constant 0 : i32
    return %c0_i32, %c0_i32_0 : i32, i32
  }
  func.func @transform_5(%arg0: i32) -> (i32, i32) {
    %c0_i32 = arith.constant 0 : i32
    %c0_i32_0 = arith.constant 0 : i32
    return %arg0, %c0_i32 : i32, i32
  }
}

</mosaic_0001>

<bundles_post_ra>
// kernel: tpu_custom_call.1
= control target key start
LH: loop header
LB: loop body
LE: loop exit
PB: predicated region body
PF: predicated region fallthrough
CT: control target
= control target key end

     0   :  { %10 = vsyncpa [#allocation3], 0  ;;  %s644_s0 = inlined_call_operand.hbm [shape: bf16[16,128], index: 0, kind: input, shape index: {}]   ;;  %s645_s1 = inlined_call_operand.hbm [shape: bf16[128,128], index: 1, kind: input, shape index: {}]   ;;  %s646_s2 = inlined_call_operand.vmem [shape: f32[1,128], index: 2, kind: input, shape index: {}]   ;;  %s647_s3 = inlined_call_operand.hbm [shape: bf16[128,128], index: 3, kind: input, shape index: {}]   ;;  %s648_s4 = inlined_call_operand.vmem [shape: f32[1,128], index: 4, kind: input, shape index: {}]   ;;  %s649_s5 = inlined_call_operand.hbm [shape: f32[16,128], index: 5, kind: output, shape index: {}]  }
   0x1   :  { %11 = vsyncpa [#allocation6], 0 }
   0x2   :  { %12 = vsyncpa [#allocation4], 0  ;;  %s534_s18 = smov [#allocation5]   ;;  %s535_s20 = smov [#allocation2]  }
   0x3   :  { %s30_s19 = sshll.u32 %s534_s18, 4  ;;  %s18_s21 = sshll.u32 %s535_s20, 4  ;;  %s31_s19 = int_to_ptr.vmem [resolvable:$true] %s30_s19  ;;  %s574_s21 = int_to_ptr.vmem [resolvable:$true] %s18_s21 }
   0x4   :  { %s440_s24 = scalar_lea.hbm %s645_s1, 1024 }
   0x5   :  { %p441_p0 = scmp.ne.s32.totalorder %s645_s1, %s440_s24  ;;  %p444_p1 = scmp.lt.u32.totalorder %s440_s24, %s645_s1 }
   0x7   :  { %p446_p2 = pnand %p444_p1, %p441_p0 }
   0x9   :  { %449 = shalt.err (!%p446_p2)
}
   0xa   :  { %s450_s29 = scalar_lea.vmem %s31_s19, 1024  ;;  %p455_p4 = scmp.lt.s32.totalorder %s31_s19, %s31_s19 }
   0xb   :  { %p451_p3 = scmp.ne.s32.totalorder %s31_s19, %s450_s29  ;;  %p456_p5 = scmp.lt.s32.totalorder %s450_s29, %s450_s29 }
   0xd   :  { %p457_p6 = por %p456_p5, %p455_p4 }
   0xf   :  { %p458_p7 = pnand %p457_p6, %p451_p3 }
  0x11   :  { %461 = shalt.err (!%p458_p7)
}
  0x12   :  { %s536_s30 = smov 64   ;;  %s537_s6 = smov 4  }
  0x13   :  { %36 = dma.hbm_to_vmem [thread:$0]  %s645_s1, 1024, %s31_s19, [#allocation6], %s536_s30, %s536_s30, %s537_s6  }
  0x14   :  { %s462_s11 = scalar_lea.hbm %s644_s0, 128 }
  0x15   :  { %p463_p8 = scmp.ne.s32.totalorder %s644_s0, %s462_s11  ;;  %p466_p9 = scmp.lt.u32.totalorder %s462_s11, %s644_s0 }
  0x17   :  { %p468_p10 = pnand %p466_p9, %p463_p8 }
  0x19   :  { %471 = shalt.err (!%p468_p10)
}
  0x1a   :  { %s472_s16 = scalar_lea.vmem %s574_s21, 128  ;;  %p477_p12 = scmp.lt.s32.totalorder %s574_s21, %s574_s21 }
  0x1b   :  { %p473_p11 = scmp.ne.s32.totalorder %s574_s21, %s472_s16  ;;  %p478_p13 = scmp.lt.s32.totalorder %s472_s16, %s472_s16 }
  0x1d   :  { %p479_p0 = por %p478_p13, %p477_p12 }
  0x1f   :  { %p480_p1 = pnand %p479_p0, %p473_p11 }
  0x21   :  { %483 = shalt.err (!%p480_p1)
}
  0x22   :  { %24 = dma.hbm_to_vmem [thread:$0]  %s644_s0, 128, %s574_s21, [#allocation3], %s536_s30, %s536_s30, %s537_s6  }
  0x23   :  { %s538_s18 = smov [#allocation7]   ;;  %s484_s23 = scalar_lea.hbm %s647_s3, 1024 }
  0x24   :  { %s44_s19 = sshll.u32 %s538_s18, 4  ;;  %p485_p2 = scmp.ne.s32.totalorder %s647_s3, %s484_s23  ;;  %s45_s19 = int_to_ptr.vmem [resolvable:$true] %s44_s19 }
  0x25   :  { %p488_p3 = scmp.lt.u32.totalorder %s484_s23, %s647_s3 }
  0x27   :  { %p490_p4 = pnand %p488_p3, %p485_p2 }
  0x29   :  { %493 = shalt.err (!%p490_p4)
}
  0x2a   :  { %s494_s28 = scalar_lea.vmem %s45_s19, 1024  ;;  %p499_p6 = scmp.lt.s32.totalorder %s45_s19, %s45_s19 }
  0x2b   :  { %p495_p5 = scmp.ne.s32.totalorder %s45_s19, %s494_s28  ;;  %p500_p7 = scmp.lt.s32.totalorder %s494_s28, %s494_s28 }
  0x2d   :  { %p501_p8 = por %p500_p7, %p499_p6 }
  0x2f   :  { %p502_p9 = pnand %p501_p8, %p495_p5 }
  0x31   :  { %505 = shalt.err (!%p502_p9)
}
  0x32   :  { %50 = dma.hbm_to_vmem [thread:$0]  %s647_s3, 1024, %s45_s19, [#allocation6], %s536_s30, %s536_s30, %s537_s6  }
  0x33   :  { %528 = dma.done.wait [#allocation3], 128  }
  0x34   :  { %529 = vsyncadd [#allocation3], 4294967168 }
  0x35   :  { %530 = dma.done.wait [#allocation6], 2048  }
  0x36   :  { %531 = vsyncadd [#allocation6], 4294965248  ;;  %v539_v0 = vmov 0.0   ;;  %vm540_vm0 = vmmov 0   ;;  %v415_v1 = vld [vmem:[#allocation5] sm:$0xff]   ;;  %v416_v2 = vld [vmem:[#allocation5 + $0x8] sm:$0xff]  }
  0x37   :  { %365 = vmatprep.subr.bf16.mxu0 %v539_v0  ;;  %381 = vmatprep.mubr.msk.bf16.mxu0 %vm540_vm0, %v539_v0  ;;  %v417_v3 = vld [vmem:[#allocation5 + $0x10] sm:$0xff]   ;;  %v424_v4 = vld [vmem:[#allocation7] sm:$0xff]   ;;  %v418_v5 = vld [vmem:[#allocation5 + $0x18] sm:$0xff]  }
  0x38   :  { %385 = vmatprep.subr.bf16.mxu1 %v539_v0  ;;  %401 = vmatprep.mubr.msk.bf16.mxu1 %vm540_vm0, %v539_v0  ;;  %v425_v6 = vld [vmem:[#allocation7 + $0x8] sm:$0xff]   ;;  %v419_v7 = vld [vmem:[#allocation5 + $0x20] sm:$0xff]   ;;  %v426_v8 = vld [vmem:[#allocation7 + $0x10] sm:$0xff]  }
  0x39   :  { %366 = vmatpush3.bf16.msra.mxu0 %v415_v1  ;;  %386 = vmatpush3.bf16.msra.mxu1 %v424_v4  ;;  %v420_v9 = vld [vmem:[#allocation5 + $0x28] sm:$0xff]   ;;  %v427_v10 = vld [vmem:[#allocation7 + $0x18] sm:$0xff]   ;;  %v421_v11 = vld [vmem:[#allocation5 + $0x30] sm:$0xff]  }
  0x3a   :  { %367 = vmatprep.subr.bf16.mxu0 %v539_v0  ;;  %387 = vmatprep.subr.bf16.mxu1 %v539_v0  ;;  %v428_v12 = vld [vmem:[#allocation7 + $0x20] sm:$0xff]   ;;  %v422_v13 = vld [vmem:[#allocation5 + $0x38] sm:$0xff]   ;;  %v429_v14 = vld [vmem:[#allocation7 + $0x28] sm:$0xff]  }
  0x3b   :  { %v423_v15 = vld [vmem:[#allocation2] sm:$0xff]   ;;  %v430_v16 = vld [vmem:[#allocation7 + $0x30] sm:$0xff]  }
  0x3c   :  { %v431_v17 = vld [vmem:[#allocation7 + $0x38] sm:$0xff]  }
  0x3d   :  { %368 = vmatpush3.bf16.msra.mxu0 %v416_v2  ;;  %388 = vmatpush3.bf16.msra.mxu1 %v425_v6  ;;  %v328_v18 = vld [vmem:[%s646_s2] ss:$0 sm:$0xff]  ;;  %s541_s2 = smov [#allocation8]  }
  0x3e   :  { %369 = vmatprep.subr.bf16.mxu0 %v539_v0  ;;  %389 = vmatprep.subr.bf16.mxu1 %v539_v0  ;;  %v338_v28 = vld [vmem:[%s648_s4] ss:$0 sm:$0xff]  ;;  %s315_s4 = sshll.u32 %s541_s2, 4  ;;  %s316_s4 = int_to_ptr.vmem [resolvable:$true] %s315_s4 }
  0x3f   :  { %s506_s7 = scalar_lea.vmem %s316_s4, 256  ;;  %p511_p11 = scmp.lt.s32.totalorder %s316_s4, %s316_s4 }
  0x40   :  { %p507_p10 = scmp.ne.s32.totalorder %s316_s4, %s506_s7  ;;  %p512_p12 = scmp.lt.s32.totalorder %s506_s7, %s506_s7 }
  0x41   :  { %370 = vmatpush3.bf16.msra.mxu0 %v417_v3  ;;  %390 = vmatpush3.bf16.msra.mxu1 %v426_v8 }
  0x42   :  { %371 = vmatprep.subr.bf16.mxu0 %v539_v0  ;;  %391 = vmatprep.subr.bf16.mxu1 %v539_v0  ;;  %p513_p13 = por %p512_p12, %p511_p11 }
  0x44   :  { %p514_p0 = pnand %p513_p13, %p507_p10 }
  0x45   :  { %372 = vmatpush3.bf16.msra.mxu0 %v418_v5  ;;  %392 = vmatpush3.bf16.msra.mxu1 %v427_v10 }
  0x46   :  { %373 = vmatprep.subr.bf16.mxu0 %v539_v0  ;;  %393 = vmatprep.subr.bf16.mxu1 %v539_v0 }
  0x49   :  { %374 = vmatpush3.bf16.msra.mxu0 %v419_v7  ;;  %394 = vmatpush3.bf16.msra.mxu1 %v428_v12 }
  0x4a   :  { %375 = vmatprep.subr.bf16.mxu0 %v539_v0  ;;  %395 = vmatprep.subr.bf16.mxu1 %v539_v0 }
  0x4d   :  { %376 = vmatpush3.bf16.msra.mxu0 %v420_v9  ;;  %396 = vmatpush3.bf16.msra.mxu1 %v429_v14 }
  0x4e   :  { %377 = vmatprep.subr.bf16.mxu0 %v539_v0  ;;  %397 = vmatprep.subr.bf16.mxu1 %v539_v0 }
  0x51   :  { %378 = vmatpush3.bf16.msra.mxu0 %v421_v11  ;;  %398 = vmatpush3.bf16.msra.mxu1 %v430_v16 }
  0x52   :  { %379 = vmatprep.subr.bf16.mxu0 %v539_v0  ;;  %399 = vmatprep.subr.bf16.mxu1 %v539_v0 }
  0x55   :  { %380 = vmatpush3.bf16.msra.mxu0 %v422_v13  ;;  %400 = vmatpush3.bf16.msra.mxu1 %v431_v17 }
  0x58   :  { %382 = vmatmul.mubr.bf16.vlgmr.msra.gmra.mrb[0].mxu0 %v423_v15 }
 0x12b   :  { %v176_v19 = vpop.f32.mrb[0].mxu0 }
 0x12c   :  { %v177_v20 = vadd.f32 %v328_v18, %v176_v19  ;;  %v383_v21 = vpop.f32.mrb[1].mxu0 }
 0x12d   :  { %v179_v22 = vpop.f32.mrb[2].mxu0 }
 0x12e   :  { %v180_v23 = vadd.f32 %v328_v18, %v179_v22  ;;  %v384_v24 = vpop.f32.mrb[3].mxu0  ;;  %v183_v25 = vmax.f32 %v177_v20, 0.0 }
 0x130   :  { %v184_v26 = vmax.f32 %v180_v23, 0.0 }
 0x132   :  { %v185_v27 = vpack.c.bf16 %v184_v26, %v183_v25 }
 0x134   :  { %402 = vmatmul.mubr.bf16.vlgmr.msra.gmra.mrb[0].mxu1 %v185_v27 }
 0x207   :  { %v291_v29 = vpop.f32.mrb[0].mxu1 }
 0x208   :  { %v292_v30 = vadd.f32 %v338_v28, %v291_v29  ;;  %v403_v31 = vpop.f32.mrb[1].mxu1 }
 0x209   :  { %v294_v32 = vpop.f32.mrb[2].mxu1 }
 0x20a   :  { %v298_v33 = vsub.f32 0.0, %v292_v30  ;;  %v295_v34 = vadd.f32 %v338_v28, %v294_v32  ;;  %v404_v35 = vpop.f32.mrb[3].mxu1 }
 0x20c   :  { %v300_v36 = vmul.f32 1.442695, %v298_v33  ;;  %v299_v37 = vsub.f32 0.0, %v295_v34 }
 0x20e   :  { %432 = vpow2.f32 %v300_v36  ;;  %v302_v38 = vmul.f32 1.442695, %v299_v37 }
 0x210   :  { %434 = vpow2.f32 %v302_v38 }
 0x218   :  { %v433_v39 = vpop.eup %432 }
 0x219   :  { %v304_v40 = vadd.f32 1.0, %v433_v39 }
 0x21a   :  { %v435_v41 = vpop.eup %434 }
 0x21b   :  { %436 = vrcp.f32 %v304_v40  ;;  %v305_v42 = vadd.f32 1.0, %v435_v41 }
 0x21d   :  { %438 = vrcp.f32 %v305_v42 }
 0x225   :  { %v437_v43 = vpop.eup %436 }
 0x226   :  { %308 = vst [vmem:[#allocation8] sm:$0xff] %v437_v43 }
 0x227   :  { %v439_v44 = vpop.eup %438 }
 0x228   :  { %309 = vst [vmem:[#allocation8 + $0x8] sm:$0xff] %v439_v44 }
 0x229   :  { %517 = shalt.err (!%p514_p0)
}
 0x22a   :  { %s518_s10 = scalar_lea.hbm %s649_s5, 256 }
 0x22b   :  { %p519_p1 = scmp.ne.s32.totalorder %s649_s5, %s518_s10  ;;  %p522_p2 = scmp.lt.u32.totalorder %s518_s10, %s649_s5 }
 0x22d   :  { %p524_p3 = pnand %p522_p2, %p519_p1 }
 0x22f   :  { %527 = shalt.err (!%p524_p3)
}
 0x230   :  { %s542_s15 = smov 128   ;;  %s543_s16 = smov 8  }
 0x231   :  { %321 = dma.vmem_to_hbm [thread:$0]  %s316_s4, 256, %s649_s5, [#allocation4], %s542_s15, %s542_s15, %s543_s16  }
 0x232   :  { %532 = dma.done.wait [#allocation4], 256  }
 0x233   :  { %533 = vsyncadd [#allocation4], 4294967040 }
 0x234   :  { %325 = vsyncpa [#allocation3], 1 }
 0x235   :  { %326 = vsyncpa [#allocation6], 1 }
 0x236   :  { %327 = vsyncpa [#allocation4], 1 }

</bundles_post_ra>
